<compile_context>
chip_gen: v6e
topology: v6e:2x2x1
jax: 0.10.0
libtpu: 0.0.40
codegen_flags: <defaults>
</compile_context>

<pallas_src>
import functools

import jax
import jax.numpy as jnp
from jax.experimental import pallas as pl
from jax.experimental.pallas import tpu as pltpu


def _round_width(width, multiplier, min_width=8, divisor=8):
    """Same rounding rule as SE._round_width in the PyTorch module."""
    if not multiplier:
        return width
    width *= multiplier
    min_width = min_width or divisor
    width_out = max(min_width, int(width + divisor / 2) // divisor * divisor)
    if width_out < 0.9 * width:
        width_out += divisor
    return int(width_out)


def _vmem_capacity_bytes():
    """Per-core VMEM capacity; conservative 64 MiB (v7x) if the query is unavailable."""
    try:
        return int(pltpu.get_tpu_info().vmem_capacity_bytes)
    except Exception:
        return 64 << 20


def _lane_tile(S, bytes_per_s, target_bytes):
    """Largest multiple-of-128 S tile under target (or full S, which is always legal)."""
    if S <= 128:
        return S
    t = (target_bytes // max(1, bytes_per_s)) // 128 * 128
    t = max(128, int(t))
    return S if t >= S else t


# ---------------------------------------------------------------------------
# Fused single-pass kernel: pool + MLP + sigmoid + scale on a VMEM-resident block
# ---------------------------------------------------------------------------
def se_fused_kernel(x_ref, w1_ref, b1_ref, w2_ref, b2_ref, o_ref, *, inv_s, relu_act):
    x = x_ref[...]                                                      # (nb, C, S)
    pooled = jnp.sum(x.astype(jnp.float32), axis=-1) * inv_s            # (nb, C) f32
    z = jnp.dot(pooled, w1_ref[...],
                preferred_element_type=jnp.float32) + b1_ref[...]       # (nb, F)
    h = jnp.maximum(z, 0.0) if relu_act else z * jax.nn.sigmoid(z)      # ReLU / Swish
    g = jax.nn.sigmoid(
        jnp.dot(h, w2_ref[...],
                preferred_element_type=jnp.float32) + b2_ref[...])      # (nb, C)
    # Native-dtype multiply (gate is cast, never a full f32 copy of the block).
    o_ref[...] = x * g.astype(x.dtype)[:, :, None]


# ---------------------------------------------------------------------------
# Two-pass fallback, pass 1: tiled global-average-pool sums (tail S tile masked)
# ---------------------------------------------------------------------------
def se_pool_kernel(x_ref, p_ref, acc_ref, *, ts, s_total, mask_tail):
    s = pl.program_id(1)

    @pl.when(s == 0)
    def _init():
        acc_ref[...] = jnp.zeros_like(acc_ref)

    xb = x_ref[...].astype(jnp.float32)                                 # (1, C, ts)
    if mask_tail:
        # Partial-block reads are unspecified in the OOB lanes -> zero them before
        # accumulating (only the last S tile actually needs it; cheap VPU select).
        lane = jax.lax.broadcasted_iota(jnp.int32, xb.shape, 2)
        xb = jnp.where(s * ts + lane < s_total, xb, 0.0)
    acc_ref[...] += jnp.sum(xb, axis=-1)                                # (1, C)

    @pl.when(s == pl.num_programs(1) - 1)
    def _store():
        p_ref[...] = acc_ref[...][None]                                 # (1, 1, C)


# ---------------------------------------------------------------------------
# Two-pass fallback, pass 2: channel-wise rescale on (N*C, S) row tiles
# ---------------------------------------------------------------------------
def se_scale_kernel(g_ref, x_ref, o_ref):
    o_ref[...] = x_ref[...] * g_ref[...].astype(x_ref.dtype)            # (rt,ts)*(rt,1)


def se_forward(x_ncthw, w1, b1, w2, b2, relu_act=True,
               max_fused_bytes=None, target_block_bytes=None):
    """SE forward. x_ncthw: (N, C, T, H, W); w1: (C, F); b1: (1, F); w2: (F, C); b2: (1, C).

    (1x1x1 Conv3d weights are (out, in) matrices; they are passed here transposed as
    (in, out) so the kernel computes pooled @ w1, matching the PyTorch module.)
    """
    N, C, T, H, W = x_ncthw.shape
    S = T * H * W
    F = w1.shape[1]
    itemsize = jnp.dtype(x_ncthw.dtype).itemsize
    inv_s = 1.0 / float(S)

    vmem_cap = _vmem_capacity_bytes()
    if max_fused_bytes is None:
        # Fused slab is double-buffered in & out (+ f32 temps) -> ~1/10 of VMEM is safe.
        max_fused_bytes = vmem_cap // 10
    if target_block_bytes is None:
        target_block_bytes = (4 << 20) if vmem_cap <= (64 << 20) else (8 << 20)

    x3 = x_ncthw.reshape(N, C, S)                 # free dim-merge, no HBM copy
    row_bytes = C * S * itemsize

    # ------------------------------ fused single pass ------------------------------
    if 0 < row_bytes <= max_fused_bytes:
        nb = max(1, int(max_fused_bytes // row_bytes))
        nb = min(nb, N)
        if N >= 2:
            nb = min(nb, pl.cdiv(N, 2))           # >=2 grid steps -> both v7x TCs fed
        n_tiles = pl.cdiv(N, nb)
        slab_bytes = nb * row_bytes
        vmem_limit = int(min(int(0.8 * vmem_cap), max(32 << 20, 8 * slab_bytes)))

        out3 = pl.pallas_call(
            functools.partial(se_fused_kernel, inv_s=inv_s, relu_act=relu_act),
            out_shape=jax.ShapeDtypeStruct((N, C, S), x_ncthw.dtype),
            grid_spec=pltpu.PrefetchScalarGridSpec(
                num_scalar_prefetch=0,
                grid=(n_tiles,),
                in_specs=[
                    pl.BlockSpec((nb, C, S), lambda n: (n, 0, 0)),      # x slab
                    pl.BlockSpec((C, F), lambda n: (0, 0)),             # W1
                    pl.BlockSpec((1, F), lambda n: (0, 0)),             # b1
                    pl.BlockSpec((F, C), lambda n: (0, 0)),             # W2
                    pl.BlockSpec((1, C), lambda n: (0, 0)),             # b2
                ],
                out_specs=pl.BlockSpec((nb, C, S), lambda n: (n, 0, 0)),
            ),
            compiler_params=pltpu.CompilerParams(
                dimension_semantics=("parallel",),
                vmem_limit_bytes=vmem_limit),
        )(x3, w1, b1, w2, b2)
        return out3.reshape(N, C, T, H, W)

    # ------------------------- two-pass fallback (large C*S) -----------------------
    # Pass 1: tiled f32 sums over S (unpadded x, tail tile masked in-kernel).
    ts1 = _lane_tile(S, C * itemsize, target_block_bytes)
    n_s1 = pl.cdiv(S, ts1)
    mask_tail = (S % ts1) != 0
    vmem_limit1 = int(min(int(0.75 * vmem_cap),
                          max(32 << 20, 8 * C * ts1 * itemsize)))

    pooled_sums = pl.pallas_call(
        functools.partial(se_pool_kernel, ts=ts1, s_total=S, mask_tail=mask_tail),
        out_shape=jax.ShapeDtypeStruct((N, 1, C), jnp.float32),
        grid_spec=pltpu.PrefetchScalarGridSpec(
            num_scalar_prefetch=0,
            grid=(N, n_s1),                                   # reduction axis last
            in_specs=[pl.BlockSpec((1, C, ts1), lambda n, s: (n, 0, s))],
            out_specs=pl.BlockSpec((1, 1, C), lambda n, s: (n, 0, 0)),
            scratch_shapes=[pltpu.VMEM((1, C), jnp.float32)],
        ),
        compiler_params=pltpu.CompilerParams(
            dimension_semantics=("parallel", "arbitrary"),
            vmem_limit_bytes=vmem_limit1),
    )(x3)

    # Tiny channel MLP + sigmoid on (N, C) pooled means (negligible next to the scan).
    pooled = pooled_sums.reshape(N, C) * inv_s
    z = pooled @ w1.astype(jnp.float32) + b1.astype(jnp.float32)
    h = jnp.maximum(z, 0.0) if relu_act else z * jax.nn.sigmoid(z)
    gates = jax.nn.sigmoid(h @ w2.astype(jnp.float32) + b2.astype(jnp.float32))  # (N, C)

    # Pass 2: rescale (N*C, S) rows -> lane/sublane-dense blocks for any (N, C, S).
    rows = N * C
    x2 = x3.reshape(rows, S)                                  # free dim-merge
    g2 = gates.reshape(rows, 1).astype(jnp.float32)           # tiny array

    if S * itemsize * 8 <= target_block_bytes:
        ts2 = S
    else:
        ts2 = _lane_tile(S, 8 * itemsize, target_block_bytes)
    rt = max(8, (target_block_bytes // max(1, ts2 * itemsize)) // 8 * 8)
    rt = min(rt, rows)                                        # full-dim block if small
    n_r = pl.cdiv(rows, rt)
    n_s2 = pl.cdiv(S, ts2)
    vmem_limit2 = int(min(int(0.75 * vmem_cap),
                          max(32 << 20, 6 * rt * ts2 * itemsize)))

    out2 = pl.pallas_call(
        se_scale_kernel,
        out_shape=jax.ShapeDtypeStruct((rows, S), x_ncthw.dtype),
        grid_spec=pltpu.PrefetchScalarGridSpec(
            num_scalar_prefetch=0,
            grid=(n_r, n_s2),
            in_specs=[
                pl.BlockSpec((rt, 1), lambda r, s: (r, 0)),   # per-row gate
                pl.BlockSpec((rt, ts2), lambda r, s: (r, s)), # x rows
            ],
            out_specs=pl.BlockSpec((rt, ts2), lambda r, s: (r, s)),
        ),
        compiler_params=pltpu.CompilerParams(
            dimension_semantics=("parallel", "parallel"),
            vmem_limit_bytes=vmem_limit2),
    )(g2, x2)

    return out2.reshape(N, C, T, H, W)


def se_reference(x, w1, b1, w2, b2, relu_act=True):
    """Pure-JAX reference for correctness checking."""
    pooled = jnp.mean(x.astype(jnp.float32), axis=(2, 3, 4))            # (N, C)
    z = pooled @ w1.astype(jnp.float32) + b1.astype(jnp.float32)
    h = jnp.maximum(z, 0.0) if relu_act else z * jax.nn.sigmoid(z)
    g = jax.nn.sigmoid(h @ w2.astype(jnp.float32) + b2.astype(jnp.float32))
    return (x.astype(jnp.float32) * g[:, :, None, None, None]).astype(x.dtype)


if __name__ == "__main__":
    ratio = 0.0625
    key = jax.random.PRNGKey(0)

    # ((N, C, T, H, W), relu_act, force_two_pass)
    #  1) S=128 lane-aligned, fused path, ReLU
    #  2) S=105 unaligned, Swish, fused path with a partial batch block (nb=2, N=3)
    #  3) S=300, forced two-pass fallback: masked tail S tile + row-tiled rescale
    configs = [
        ((2, 16, 2, 8, 8), True, False),
        ((3, 24, 3, 7, 5), False, False),
        ((3, 24, 3, 10, 10), True, True),
    ]

    for (shape, relu_act, force_two_pass) in configs:
        N, C, T, H, W = shape
        F = _round_width(C, ratio)
        key, kx, k1, k2, k3, k4 = jax.random.split(key, 6)

        x = jax.random.normal(kx, (N, C, T, H, W), dtype=jnp.float32)
        # Conv3d 1x1x1 weights == (out, in) matrices, stored transposed (in, out).
        w1 = jax.random.normal(k1, (C, F), dtype=jnp.float32) * 0.1
        b1 = jax.random.normal(k2, (1, F), dtype=jnp.float32) * 0.1
        w2 = jax.random.normal(k3, (F, C), dtype=jnp.float32) * 0.1
        b2 = jax.random.normal(k4, (1, C), dtype=jnp.float32) * 0.1

        kwargs = {}
        if force_two_pass:
            # Tiny budgets to exercise the tiled fallback (masking + row tiling) even
            # at these small test shapes.
            kwargs = dict(max_fused_bytes=0, target_block_bytes=16 * 1024)

        out = se_forward(x, w1, b1, w2, b2, relu_act=relu_act, **kwargs)
        jax.block_until_ready(out)

        ref = se_reference(x, w1, b1, w2, b2, relu_act=relu_act)
        assert out.shape == x.shape and out.dtype == x.dtype
        # Tolerance covers MXU-vs-XLA default matmul precision differences in the
        # tiny channel MLP; real indexing/gating bugs would be orders of magnitude off.
        assert jnp.allclose(out, ref, atol=1e-3, rtol=1e-3), "mismatch vs reference"

    print("KERNEL_OK")
</pallas_src>

<mosaic_0001>
module attributes {stable_mosaic.version = 11 : i64} {
  func.func @se_fused_kernel(%arg0: i32, %arg1: memref<1x16x128xf32, #tpu.memory_space<vmem>>, %arg2: memref<16x8xf32, #tpu.memory_space<vmem>>, %arg3: memref<1x8xf32, #tpu.memory_space<vmem>>, %arg4: memref<8x16xf32, #tpu.memory_space<vmem>>, %arg5: memref<1x16xf32, #tpu.memory_space<vmem>>, %arg6: memref<1x16x128xf32, #tpu.memory_space<vmem>>) attributes {dimension_semantics = [#tpu.dimension_semantics<parallel>], iteration_bounds = array<i64: 2>, scalar_prefetch = 0 : i64, scratch_operands = 0 : i64, tpu.core_type = #tpu.core_type<tc>, window_params = [{transform_indices = @transform_0, window_bounds = array<i64: 1, 16, 128>}, {pipeline_mode = #tpu.pipeline_mode<synchronous>, transform_indices = @transform_1, window_bounds = array<i64: 16, 8>}, {pipeline_mode = #tpu.pipeline_mode<synchronous>, transform_indices = @transform_2, window_bounds = array<i64: 1, 8>}, {pipeline_mode = #tpu.pipeline_mode<synchronous>, transform_indices = @transform_3, window_bounds = array<i64: 8, 16>}, {pipeline_mode = #tpu.pipeline_mode<synchronous>, transform_indices = @transform_4, window_bounds = array<i64: 1, 16>}, {transform_indices = @transform_5, window_bounds = array<i64: 1, 16, 128>}]} {
    %c0 = arith.constant 0 : index
    %c0_0 = arith.constant 0 : index
    %c0_1 = arith.constant 0 : index
    %0 = vector.load %arg1[%c0, %c0_0, %c0_1] : memref<1x16x128xf32, #tpu.memory_space<vmem>>, vector<1x16x128xf32>
    %cst = arith.constant dense<0.000000e+00> : vector<1x16xf32>
    %1 = vector.multi_reduction <add>, %0, %cst [2] : vector<1x16x128xf32> to vector<1x16xf32>
    %cst_2 = arith.constant 7.812500e-03 : f32
    %2 = vector.broadcast %cst_2 : f32 to vector<1x16xf32>
    %3 = arith.mulf %1, %2 : vector<1x16xf32>
    %c0_3 = arith.constant 0 : index
    %c0_4 = arith.constant 0 : index
    %4 = vector.load %arg2[%c0_3, %c0_4] : memref<16x8xf32, #tpu.memory_space<vmem>>, vector<16x8xf32>
    %cst_5 = arith.constant dense<0.000000e+00> : vector<1x8xf32>
    %5 = tpu.matmul %3, %4, %cst_5 {dimension_numbers = #tpu.dot_dimension_numbers<[1], [0], [0], [1], [0, 0, 1, 1], [], []>} : vector<1x16xf32>, vector<16x8xf32>, vector<1x8xf32> -> vector<1x8xf32>
    %c0_6 = arith.constant 0 : index
    %c0_7 = arith.constant 0 : index
    %6 = vector.load %arg3[%c0_6, %c0_7] : memref<1x8xf32, #tpu.memory_space<vmem>>, vector<1x8xf32>
    %7 = arith.addf %5, %6 : vector<1x8xf32>
    %cst_8 = arith.constant 0.000000e+00 : f32
    %8 = vector.broadcast %cst_8 : f32 to vector<1x8xf32>
    %9 = arith.maximumf %7, %8 : vector<1x8xf32>
    %c0_9 = arith.constant 0 : index
    %c0_10 = arith.constant 0 : index
    %10 = vector.load %arg4[%c0_9, %c0_10] : memref<8x16xf32, #tpu.memory_space<vmem>>, vector<8x16xf32>
    %cst_11 = arith.constant dense<0.000000e+00> : vector<1x16xf32>
    %11 = tpu.matmul %9, %10, %cst_11 {dimension_numbers = #tpu.dot_dimension_numbers<[1], [0], [0], [1], [0, 0, 1, 1], [], []>} : vector<1x8xf32>, vector<8x16xf32>, vector<1x16xf32> -> vector<1x16xf32>
    %c0_12 = arith.constant 0 : index
    %c0_13 = arith.constant 0 : index
    %12 = vector.load %arg5[%c0_12, %c0_13] : memref<1x16xf32, #tpu.memory_space<vmem>>, vector<1x16xf32>
    %13 = arith.addf %11, %12 : vector<1x16xf32>
    %14 = arith.negf %13 : vector<1x16xf32>
    %15 = math.exp %14 : vector<1x16xf32>
    %cst_14 = arith.constant 1.000000e+00 : f32
    %16 = vector.broadcast %cst_14 : f32 to vector<1x16xf32>
    %17 = arith.addf %16, %15 : vector<1x16xf32>
    %18 = arith.divf %16, %17 : vector<1x16xf32>
    %19 = vector.shape_cast %18 : vector<1x16xf32> to vector<1x16x1xf32>
    %20 = vector.broadcast %19 : vector<1x16x1xf32> to vector<1x16x128xf32>
    %21 = arith.mulf %0, %20 : vector<1x16x128xf32>
    %c0_15 = arith.constant 0 : index
    %c0_16 = arith.constant 0 : index
    %c0_17 = arith.constant 0 : index
    %22 = vector.load %arg6[%c0_15, %c0_16, %c0_17] : memref<1x16x128xf32, #tpu.memory_space<vmem>>, vector<1x16x128xf32>
    tpu.vector_store %arg6[%c0_15, %c0_16, %c0_17], %21 {strides = array<i32>} : memref<1x16x128xf32, #tpu.memory_space<vmem>>, vector<1x16x128xf32>,
    return
  }
  func.func @transform_0(%arg0: i32) -> (i32, i32, i32) {
    %c0_i32 = arith.constant 0 : i32
    %c0_i32_0 = arith.constant 0 : i32
    %c0_i32_1 = arith.constant 0 : i32
    return %arg0, %c0_i32, %c0_i32_0 : i32, i32, i32
  }
  func.func @transform_1(%arg0: i32) -> (i32, i32) {
    %c0_i32 = arith.constant 0 : i32
    %c0_i32_0 = arith.constant 0 : i32
    %c0_i32_1 = arith.constant 0 : i32
    return %c0_i32, %c0_i32_0 : i32, i32
  }
  func.func @transform_2(%arg0: i32) -> (i32, i32) {
    %c0_i32 = arith.constant 0 : i32
    %c0_i32_0 = arith.constant 0 : i32
    %c0_i32_1 = arith.constant 0 : i32
    return %c0_i32, %c0_i32_0 : i32, i32
  }
  func.func @transform_3(%arg0: i32) -> (i32, i32) {
    %c0_i32 = arith.constant 0 : i32
    %c0_i32_0 = arith.constant 0 : i32
    %c0_i32_1 = arith.constant 0 : i32
    return %c0_i32, %c0_i32_0 : i32, i32
  }
  func.func @transform_4(%arg0: i32) -> (i32, i32) {
    %c0_i32 = arith.constant 0 : i32
    %c0_i32_0 = arith.constant 0 : i32
    %c0_i32_1 = arith.constant 0 : i32
    return %c0_i32, %c0_i32_0 : i32, i32
  }
  func.func @transform_5(%arg0: i32) -> (i32, i32, i32) {
    %c0_i32 = arith.constant 0 : i32
    %c0_i32_0 = arith.constant 0 : i32
    %c0_i32_1 = arith.constant 0 : i32
    return %arg0, %c0_i32, %c0_i32_0 : i32, i32, i32
  }
}

</mosaic_0001>

<bundles_post_ra>
// kernel: tpu_custom_call.1
= control target key start
LH: loop header
LB: loop body
LE: loop exit
PB: predicated region body
PF: predicated region fallthrough
CT: control target
= control target key end

     0   :  { %10 = vsyncpa [#allocation3], 0  ;;  %s924_s0 = inlined_call_operand.hbm [shape: f32[2,16,128], index: 0, kind: input, shape index: {}]   ;;  %s925_s1 = inlined_call_operand.vmem [shape: f32[16,8], index: 1, kind: input, shape index: {}]   ;;  %s926_s2 = inlined_call_operand.vmem [shape: f32[1,8], index: 2, kind: input, shape index: {}]   ;;  %s927_s3 = inlined_call_operand.vmem [shape: f32[8,16], index: 3, kind: input, shape index: {}]   ;;  %s928_s4 = inlined_call_operand.vmem [shape: f32[1,16], index: 4, kind: input, shape index: {}]   ;;  %s929_s5 = inlined_call_operand.hbm [shape: f32[2,16,128], index: 5, kind: output, shape index: {}]  }
   0x1   :  { %12 = vsyncpa [#allocation3 + $0x1], 0 }
   0x2   :  { %13 = vsyncpa [#allocation4], 0 }
   0x3   :  { %15 = vsyncpa [#allocation4 + $0x1], 0  ;;  %s751_s18 = smov 0   ;;  %s753_s19 = smov 0  }
   0x4   :  { %s755_s20 = smov 0   ;;  %s757_s21 = smov 0  }
   0x5 LB: > { %s772_s22 = sadd.s32 4294967295, %s711_s21   ;;  %s527_s23 = sadd.s32 4294967294, %s711_s21   ;;  %s711_s21 = sphi %s757_s21, %s944_s21   ;;  %s707_s20 = sphi %s755_s20, %s943_s20   ;;  %s703_s19 = sphi %s753_s19, %s942_s19   ;;  %s699_s18 = sphi %s751_s18, %s941_s18  }
   0x6   : > { %s776_s24 = sadd.s32 1, %s711_s21   ;;  %s28_s25 = sadd.s32 1, %s707_s20 }
   0x7   : > { %s25_s26 = ssub.s32 %s711_s21, %s776_s24  ;;  %p35_p0 = scmp.ne.s32.totalorder %s707_s20, %s703_s19 }
   0x8   : > { %p26_p1 = scmp.eq.s32.totalorder %s25_s26, 0  ;;  %p36_p2 = scmp.eq.s32.totalorder %s711_s21, 0 }
   0x9   : > { %p41_p3 = scmp.ne.s32.totalorder %s703_s19, %s699_s18  ;;  %p42_p4 = scmp.eq.s32.totalorder %s772_s22, 0 }
   0xa   : > { %s788_s27 = scalar_select %p26_p1, %s707_s20, %s28_s25  }
   0xb   : > { %p790_p5 = por %p36_p2, %p35_p0  ;;  %p794_p6 = por %p42_p4, %p41_p3 }
   0xc   : > { %p149_p7 = scmp.eq.s32.totalorder %s772_s22, 1  ;;  %p155_p8 = scmp.eq.s32.totalorder %s527_s23, 1 }
   0xd   : > { %s933_s29 = scalar_select %p794_p6, 1, 0 }
   0xe   : > { %p575_p10 = scmp.lt.s32.totalorder %s711_s21, 2  ;;  %p801_p11 = por %p149_p7, %p35_p0 }
   0xf   : > { %p805_p12 = por %p155_p8, %p41_p3  ;;  %s187_s7 = sand.u32 1, %s707_s20  }
  0x10   : > { %s934_s30 = scalar_select %p801_p11, 1, 0 }
  0x11   : > { %s935_s6 = scalar_select %p805_p12, 1, 0 }
  0x12   : > { %s544_s8 = sshll.u32 %s711_s21, 8  ;;  %s530_s9 = sshll.u32 %s187_s7, 4 }
  0x13   : > { %s814_s12 = scalar_lea.hbm %s924_s0, %s544_s8  ;;  %s191_s13 = scalar_lea.vmem [#allocation2], %s530_s9 }
  0x14   : > { %s198_s14 = sshll.u32 %s191_s13, 4  ;;  %p818_p13 = pnand %p575_p10, %p790_p5  ;;  %s822_s14 = int_to_ptr.vmem [resolvable:$true] %s198_s14 }
  0x15   : > { %s824_s16 = scalar_lea.sflag [#allocation3], %s187_s7  ;;  %s619_s17 = scalar_lea.hbm %s814_s12, 256 }
  0x16   : > { %p620_p0 = scmp.ne.s32.totalorder %s814_s12, %s619_s17  ;;  %p621_p1 = pneg %p818_p13 }
  0x17   : > { %s624_s26 = scalar_lea.hbm %s924_s0, 512  ;;  %p625_p4 = scmp.lt.s32.totalorder %s814_s12, %s924_s0 }
  0x18   : > { %p622_p2 = pnand %p621_p1, %p620_p0  ;;  %p626_p5 = scmp.lt.s32.totalorder %s624_s26, %s619_s17 }
  0x1a   : > { %p623_p3 = pneg %p622_p2  ;;  %p627_p7 = por %p626_p5, %p625_p4 }
  0x1c   : > { %p628_p8 = pnand %p627_p7, %p623_p3 }
  0x1e   : > { %631 = shalt.err (!%p628_p8)
}
  0x1f   : > { %s632_s7 = scalar_lea.vmem %s822_s14, 256  ;;  %s713_s9 = smov [#allocation2]  }
  0x20   : > { %p633_p10 = scmp.ne.s32.totalorder %s822_s14, %s632_s7  ;;  %s637_s10 = sshll.u32 %s713_s9, 4  ;;  %s638_s10 = int_to_ptr.vmem [resolvable:$false] %s637_s10 }
  0x21   : > { %s639_s11 = scalar_lea.vmem %s638_s10, 512  ;;  %p640_p2 = scmp.lt.s32.totalorder %s822_s14, %s638_s10 }
  0x22   : > { %p635_p9 = pnand %p633_p10, %p621_p1  ;;  %p641_p12 = scmp.lt.s32.totalorder %s639_s11, %s632_s7 }
  0x24   : > { %p636_p0 = pneg %p635_p9  ;;  %p642_p11 = por %p641_p12, %p640_p2 }
  0x26   : > { %p643_p6 = pnand %p642_p11, %p636_p0 }
  0x28   : > { %646 = shalt.err (!%p643_p6)
}
  0x29   : > { %s714_s13 = smov 128   ;;  %s715_s17 = smov 8  }
  0x2a   : > { %570 = dma.hbm_to_vmem [thread:$0]  (!%p818_p13), %s814_s12, 256, %s822_s14, %s824_s16, %s714_s13, %s714_s13, %s715_s17  }
  0x2b   : > { %p533_p9 = scmp.ge.s32.totalorder %s711_s21, 1  ;;  %p206_p1 = scmp.lt.s32.totalorder %s711_s21, 3 }
  0x2d   : > { %p207_p3 = pnand %p533_p9, %p206_p1 }
  0x2e   : > { %s848_s23 = sand.u32 (!%p207_p3), 1, %s703_s19   ;;  %p937_p6 = scmp.ne.s32.totalorder (!%p207_p3), %s933_s29, 0 }
  0x2f   : > { %210 = sbr.rel (%p207_p3) target bundleno = 762 (0x2fa), region = 40  ;;  %s534_s25 = sshll.u32 (!%p207_p3), %s848_s23, 4 }
  0x30   : > { %s213_s26 = scalar_lea.sflag (!%p207_p3), [#allocation3], %s848_s23  ;;  %s216_s28 = scalar_lea.vmem (!%p207_p3), [#allocation2], %s534_s25 }
  0x34   : > { %690 = dma.done.wait (%p937_p6), %s213_s26, 256  }
  0x35   : > { %692 = vsyncadd (%p937_p6), %s213_s26, 4294967040  ;;  %v243_v0 = vld [vmem:[%s216_s28] sm:$0xff]  ;;  %v244_v1 = vld [vmem:[%s216_s28 + $0x8] sm:$0xff]  ;;  %v716_v2 = vmov 0.0   ;;  %vm717_vm0 = vmmov 0   ;;  %v256_v5 = vlaneseq  ;;  %vm267_vm1 = vcmask 130112  }
  0x36   : > { %245 = vadd.xlane.f32.xlu0 %v243_v0  ;;  %551 = vmatprep.subr.mxu0 %v716_v2  ;;  %v252_v3 = vld [vmem:[%s925_s1 + $0x8] sm:$0xff]  ;;  %v251_v4 = vld [vmem:[%s925_s1] sm:$0xff]  ;;  %vm269_vm2 = vcmask 130048   ;;  %vm345_vm3 = vcmask 64512   ;;  %s242_s13 = scalar_lea.vmem [#allocation5], %s534_s25  ;;  %s545_s26 = sshll.u32 %s772_s22, 8 }
  0x37   : > { %558 = vmatprep.subr.mxu1 %v716_v2  ;;  %552 = vmatpush3.msra.mxu0 %v252_v3  ;;  %v257_v6 = vand.u32 127, %v256_v5  ;;  %v259_v7 = vshrl.u32 %v256_v5, 7  ;;  %v343_v18 = vld [vmem:[%s927_s3] sm:$0xff]  ;;  %s454_s17 = sshll.u32 %s242_s13, 4  ;;  %s881_s14 = scalar_lea.hbm %s929_s5, %s545_s26  ;;  %s876_s17 = int_to_ptr.vmem [resolvable:$true] %s454_s17 }
  0x38   : > { %553 = vmatprep.subr.mxu0 %v716_v2  ;;  %555 = vmatprep.mubr.msk.f32.mxu0 %vm717_vm0, %v716_v2  ;;  %v253_v19 = vld [vmem:[%s926_s2] sm:$0x1]  ;;  %s441_s15 = scalar_lea.sflag [#allocation4], %s848_s23  ;;  %s647_s25 = scalar_lea.vmem %s876_s17, 256 }
  0x39   : > { %554 = vmatpush3.msra.mxu0 %v251_v4  ;;  %560 = vmatprep.mubr.msk.f32.mxu1 %vm717_vm0, %v716_v2  ;;  %v262_v8 = vadd.s32 4294967288, %v257_v6  ;;  %v260_v10 = vsub.s32 %v257_v6, %v259_v7  ;;  %v344_v24 = vld [vmem:[%s928_s4] sm:$0x1]  ;;  %v427_v31 = vsub.s32 0, %v259_v7  ;;  %p648_p11 = scmp.ne.s32.totalorder %s876_s17, %s647_s25  ;;  %p938_p12 = scmp.ne.s32.totalorder %s934_s30, 0 }
  0x3a   : > { %247 = vadd.xlane.f32.xlu0 %v244_v1  ;;  %559 = vmatpush3.msra.mxu1 %v343_v18  ;;  %s718_s22 = smov [#allocation5]  }
  0x3b   : > { %v265_v12 = vsub.s32 %v262_v8, %v259_v7  ;;  %p649_p13 = pnand %p648_p11, %p938_p12  ;;  %s651_s16 = sshll.u32 %s718_s22, 4  ;;  %s652_s16 = int_to_ptr.vmem [resolvable:$false] %s651_s16 }
  0x3c   : > { %s653_s29 = scalar_lea.vmem %s652_s16, 512  ;;  %p654_p5 = scmp.lt.s32.totalorder %s876_s17, %s652_s16 }
  0x3d   : > { %p650_p4 = pneg %p649_p13  ;;  %p655_p7 = scmp.lt.s32.totalorder %s653_s29, %s647_s25 }
  0x3f   : > { %p656_p8 = por %p655_p7, %p654_p5 }
  0x41   : > { %p657_p10 = pnand %p656_p8, %p650_p4 }
  0xbf   : > { %v246_v9 = vpop.xlane.xlu0 %245 }
  0xc0   : > { %v249_v11 = vmul.f32 0.0078125, %v246_v9 }
  0xc2   : > { %v261_v15 = vrot.slane %v249_v11, %v260_v10 }
  0xc3   : > { %v248_v13 = vpop.xlane.xlu0 %247 }
  0xc4   : > { %v250_v14 = vmul.f32 0.0078125, %v248_v13 }
  0xc6   : > { %v266_v16 = vrot.slane %v250_v14, %v265_v12 }
  0xc8   : > { %v268_v17 = vsel %vm267_vm1, %v266_v16, %v261_v15 }
  0xc9   : > { %556 = vmatmul.mubr.msk.f32.vlgmr.msra.gmra.mxu0 %vm269_vm2, %v268_v17 }
 0x189   : > { %v338_v20 = vpop.f32.mrf.mxu0 }
 0x18a   : > { %v339_v21 = vadd.f32 %v338_v20, %v253_v19 }
 0x18b   : > { %v557_v22 = vpop.f32.mrf.mxu0 }
 0x18c   : > { %v342_v23 = vmax.f32 %v339_v21, 0.0 }
 0x18e   : > { %561 = vmatmul.mubr.msk.f32.vlgmr.msra.gmra.mxu1 %vm345_vm3, %v342_v23 }
 0x24e   : > { %v415_v25 = vpop.f32.mrf.mxu1 }
 0x24f   : > { %v416_v26 = vadd.f32 %v415_v25, %v344_v24 }
 0x250   : > { %v562_v27 = vpop.f32.mrf.mxu1 }
 0x251   : > { %v538_v28 = vmul.f32 -1.442695, %v416_v26 }
 0x253   : > { %615 = vpow2.f32 %v538_v28 }
 0x260   : > { %v616_v29 = vpop.eup %615 }
 0x261   : > { %v422_v30 = vadd.f32 1.0, %v616_v29 }
 0x263   : > { %617 = vrcp.f32 %v422_v30 }
 0x270   : > { %v618_v32 = vpop.eup %617 }
 0x271   : > { %v428_v33 = vrot.slane %v618_v32, %v427_v31 }
 0x273   : > { %430 = vbcast.lane.b32.xlu1 %v428_v33, 256 }
 0x277   : > { %434 = vbcast.lane.b32.xlu1 %v428_v33, 264 }
 0x2e5   : > { %v431_v34 = vpop.permute.xlu1 %430 }
 0x2e6   : > { %v436_v35 = vmul.f32 %v431_v34, %v243_v0 }
 0x2e8   : > { %438 = vst [vmem:[%s242_s13] sm:$0xff] %v436_v35 }
 0x2e9   : > { %v435_v36 = vpop.permute.xlu1 %434 }
 0x2ea   : > { %v437_v37 = vmul.f32 %v435_v36, %v244_v1 }
 0x2ec   : > { %439 = vst [vmem:[%s242_s13 + $0x8] sm:$0xff] %v437_v37 }
 0x2ed   : > { %660 = shalt.err (!%p657_p10)
}
 0x2ee   : > { %s661_s8 = scalar_lea.hbm %s881_s14, 256  ;;  %s665_s10 = scalar_lea.hbm %s929_s5, 512 }
 0x2ef   : > { %p662_p0 = scmp.ne.s32.totalorder %s881_s14, %s661_s8  ;;  %p666_p1 = scmp.lt.s32.totalorder %s881_s14, %s929_s5 }
 0x2f0   : > { %p667_p3 = scmp.lt.s32.totalorder %s665_s10, %s661_s8 }
 0x2f1   : > { %p663_p2 = pnand %p662_p0, %p938_p12 }
 0x2f2   : > { %p668_p6 = por %p667_p3, %p666_p1 }
 0x2f3   : > { %p664_p9 = pneg %p663_p2 }
 0x2f5   : > { %p669_p11 = pnand %p668_p6, %p664_p9 }
 0x2f7   : > { %672 = shalt.err (!%p669_p11)
}
 0x2f8   : > { %s719_s26 = smov 128   ;;  %s720_s28 = smov 8  }
 0x2f9   : > { %565 = dma.vmem_to_hbm [thread:$0]  (%p938_p12), %s876_s17, 256, %s881_s14, %s441_s15, %s719_s26, %s719_s26, %s720_s28  }
 0x2fa PF: > { %s469_s12 = sand.u32 1, %s699_s18   ;;  %p939_p13 = scmp.ne.s32.totalorder %s935_s6, 0 }
 0x2fb   : > { %p940_p4 = scmp.ge.s32.totalorder %s711_s21, 2  ;;  %s470_s25 = scalar_lea.sflag [#allocation4], %s469_s12 }
 0x2fd   : > { %p572_p5 = pnand %p940_p4, %p939_p13 }
 0x2ff   : > { %p573_p7 = pneg %p572_p5 }
 0x301   : > { %694 = dma.done.wait (%p573_p7), %s470_s25, 256  }
 0x302   : > { %696 = vsyncadd (%p573_p7), %s470_s25, 4294967040  ;;  %p18_p8 = scmp.ge.s32.totalorder %s776_s24, 4   ;;  %s941_s18 = smov %s703_s19 }
 0x303   : > { %s942_s19 = smov %s707_s20  ;;  %s943_s20 = smov %s788_s27 }
 0x304   : > { %s944_s21 = smov %s776_s24  ;;  %20 = sbr.rel (!%p18_p8) target bundleno = 5 (0x5), region = 85 }
 0x309   :  { %475 = vsyncpa [#allocation3], 1 }
 0x30a   :  { %477 = vsyncpa [#allocation3 + $0x1], 1 }
 0x30b   :  { %478 = vsyncpa [#allocation4], 1 }
 0x30c   :  { %480 = vsyncpa [#allocation4 + $0x1], 1 }

</bundles_post_ra>
